<compile_context>
chip_gen: v5e
topology: v5e:2x2
jax: 0.10.0
libtpu: 0.0.40
codegen_flags: <defaults>
</compile_context>

<pallas_src>
import jax
import jax.numpy as jnp
from jax.experimental import pallas as pl
from jax.experimental.pallas import tpu as pltpu

HIDDEN1 = 512
HIDDEN2 = 256
LANE = 128
SUBLANE = 8


def _cdiv(a, b):
    return (a + b - 1) // b


def _round_up(x, m):
    return _cdiv(x, m) * m


# --------------------------------------------------------------------------
# Kernels
# --------------------------------------------------------------------------
def mlp_kernel_fused(x_ref, w1_ref, b1_ref, w2_ref, b2_ref, w3_ref, b3_ref,
                     o_ref):
    """Single-K-tile path: whole (padded) input_dim fits in one block."""
    # fc1 + ReLU (bf16 operands, f32 accumulation on the MXU)
    h1 = jnp.dot(x_ref[...], w1_ref[...], preferred_element_type=jnp.float32)
    h1 = jnp.maximum(h1 + b1_ref[...], 0.0).astype(jnp.bfloat16)
    # fc2 + ReLU
    h2 = jnp.dot(h1, w2_ref[...], preferred_element_type=jnp.float32)
    h2 = jnp.maximum(h2 + b2_ref[...], 0.0).astype(jnp.bfloat16)
    # fc3 (no activation)
    out = jnp.dot(h2, w3_ref[...], preferred_element_type=jnp.float32)
    o_ref[...] = (out + b3_ref[...]).astype(o_ref.dtype)


def mlp_kernel_ksplit(x_ref, w1_ref, b1_ref, w2_ref, b2_ref, w3_ref, b3_ref,
                      o_ref, acc_ref):
    """K-tiled path: fc1 contraction accumulated over the trailing grid axis."""
    k = pl.program_id(1)

    @pl.when(k == 0)
    def _():
        acc_ref[...] = jnp.zeros_like(acc_ref)

    # Partial fc1: accumulate x_tile @ w1_tile into the f32 scratch.
    acc_ref[...] += jnp.dot(x_ref[...], w1_ref[...],
                            preferred_element_type=jnp.float32)

    @pl.when(k == pl.num_programs(1) - 1)
    def _():
        h1 = jnp.maximum(acc_ref[...] + b1_ref[...], 0.0).astype(jnp.bfloat16)
        h2 = jnp.dot(h1, w2_ref[...], preferred_element_type=jnp.float32)
        h2 = jnp.maximum(h2 + b2_ref[...], 0.0).astype(jnp.bfloat16)
        out = jnp.dot(h2, w3_ref[...], preferred_element_type=jnp.float32)
        o_ref[...] = (out + b3_ref[...]).astype(o_ref.dtype)


# --------------------------------------------------------------------------
# Wrapper
# --------------------------------------------------------------------------
def resnet18_forward(x, params, *, block_batch=1024, block_k=512,
                     out_dtype=jnp.float32):
    w1, b1, w2, b2, w3, b3 = params
    batch, input_dim = x.shape
    num_classes = w3.shape[1]

    # ---- batch tiling: balanced tiles (multiple of 8), >=2 steps when it
    #      helps v7x's two TensorCores ------------------------------------
    num_tiles = max(_cdiv(batch, block_batch),
                    2 if batch >= 2 * SUBLANE else 1)
    tb = _round_up(_cdiv(batch, num_tiles), SUBLANE)
    num_tiles = _cdiv(batch, tb)
    padded_batch = num_tiles * tb

    # ---- K (input_dim) tiling, lane-padded to 128 -------------------------
    padded_in = _round_up(max(input_dim, LANE), LANE)
    k_tiles = _cdiv(padded_in, block_k)
    tk = _round_up(_cdiv(padded_in, k_tiles), LANE)
    k_tiles = _cdiv(padded_in, tk)
    padded_in = k_tiles * tk

    if (padded_batch, padded_in) != (batch, input_dim):
        x = jnp.pad(x, ((0, padded_batch - batch),
                        (0, padded_in - input_dim)))
    if padded_in != input_dim:
        w1 = jnp.pad(w1, ((0, padded_in - input_dim), (0, 0)))

    # ---- lane-pad the output so the final store is unmasked --------------
    padded_classes = _round_up(num_classes, LANE)
    if padded_classes != num_classes:
        w3 = jnp.pad(w3, ((0, 0), (0, padded_classes - num_classes)))
        b3 = jnp.pad(b3, ((0, 0), (0, padded_classes - num_classes)))

    # ---- bf16 operands (f32 accumulation in-kernel); biases stay f32 -----
    x_bf = x.astype(jnp.bfloat16)
    w1_bf = w1.astype(jnp.bfloat16)
    w2_bf = w2.astype(jnp.bfloat16)
    w3_bf = w3.astype(jnp.bfloat16)

    if k_tiles == 1:
        kernel = mlp_kernel_fused
        grid = (num_tiles,)
        x_spec = pl.BlockSpec((tb, tk), lambda i: (i, 0))
        w1_spec = pl.BlockSpec((tk, HIDDEN1), lambda i: (0, 0))
        const = lambda shape: pl.BlockSpec(shape, lambda i: (0, 0))
        out_spec = pl.BlockSpec((tb, padded_classes), lambda i: (i, 0))
        scratch = []
        dims = ("parallel",)
    else:
        kernel = mlp_kernel_ksplit
        grid = (num_tiles, k_tiles)
        x_spec = pl.BlockSpec((tb, tk), lambda i, k: (i, k))
        w1_spec = pl.BlockSpec((tk, HIDDEN1), lambda i, k: (k, 0))
        const = lambda shape: pl.BlockSpec(shape, lambda i, k: (0, 0))
        out_spec = pl.BlockSpec((tb, padded_classes), lambda i, k: (i, 0))
        scratch = [pltpu.VMEM((tb, HIDDEN1), jnp.float32)]
        dims = ("parallel", "arbitrary")

    out = pl.pallas_call(
        kernel,
        out_shape=jax.ShapeDtypeStruct((padded_batch, padded_classes),
                                       out_dtype),
        grid=grid,
        in_specs=[
            x_spec,                                # x tile
            w1_spec,                               # w1 (K-tiled or resident)
            const((1, HIDDEN1)),                   # b1 (VMEM-resident)
            const((HIDDEN1, HIDDEN2)),             # w2 (VMEM-resident)
            const((1, HIDDEN2)),                   # b2
            const((HIDDEN2, padded_classes)),      # w3 (lane-padded)
            const((1, padded_classes)),            # b3 (lane-padded)
        ],
        out_specs=out_spec,
        scratch_shapes=scratch,
        compiler_params=pltpu.CompilerParams(
            dimension_semantics=dims,
            vmem_limit_bytes=48 * 1024 * 1024,
        ),
    )(x_bf, w1_bf, b1, w2_bf, b2, w3_bf, b3)

    return out[:batch, :num_classes]


# --------------------------------------------------------------------------
# Init / reference
# --------------------------------------------------------------------------
def init_linear(key, fan_in, fan_out):
    # Mirror torch.nn.Linear default init: U(-1/sqrt(fan_in), 1/sqrt(fan_in))
    kw, kb = jax.random.split(key)
    bound = 1.0 / float(jnp.sqrt(fan_in))
    w = jax.random.uniform(kw, (fan_in, fan_out), jnp.float32, -bound, bound)
    b = jax.random.uniform(kb, (1, fan_out), jnp.float32, -bound, bound)
    return w, b


def init_params(key, input_dim, num_classes):
    k1, k2, k3 = jax.random.split(key, 3)
    w1, b1 = init_linear(k1, input_dim, HIDDEN1)
    w2, b2 = init_linear(k2, HIDDEN1, HIDDEN2)
    w3, b3 = init_linear(k3, HIDDEN2, num_classes)
    return (w1, b1, w2, b2, w3, b3)


def reference_forward(x, params):
    w1, b1, w2, b2, w3, b3 = params
    h1 = jnp.maximum(x @ w1 + b1, 0.0)
    h2 = jnp.maximum(h1 @ w2 + b2, 0.0)
    return h2 @ w3 + b3


if __name__ == "__main__":
    def check(batch, input_dim, num_classes, **kw):
        key = jax.random.PRNGKey(0)
        kx, kp = jax.random.split(key)
        x = jax.random.normal(kx, (batch, input_dim), dtype=jnp.float32)
        params = init_params(kp, input_dim, num_classes)
        out = jax.block_until_ready(resnet18_forward(x, params, **kw))
        ref = reference_forward(x, params)
        assert out.shape == (batch, num_classes)
        # bf16 operands -> looser tolerance vs. the f32 reference.
        assert jnp.allclose(out, ref, atol=5e-2, rtol=5e-2), (
            f"mismatch vs JAX reference (batch={batch}, input_dim={input_dim})")

    # Demo-sized: single batch tile, single K tile (fused kernel path).
    check(8, 32, 16)
    # Exercise the multi-batch-tile + K-split (accumulator) path.
    check(24, 700, 10, block_batch=16, block_k=256)

    print("KERNEL_OK")
</pallas_src>

<mosaic_0001>
module attributes {stable_mosaic.version = 11 : i64} {
  func.func @mlp_kernel_fused(%arg0: i32, %arg1: memref<8x128xbf16, #tpu.memory_space<vmem>>, %arg2: memref<128x512xbf16, #tpu.memory_space<vmem>>, %arg3: memref<1x512xf32, #tpu.memory_space<vmem>>, %arg4: memref<512x256xbf16, #tpu.memory_space<vmem>>, %arg5: memref<1x256xf32, #tpu.memory_space<vmem>>, %arg6: memref<256x128xbf16, #tpu.memory_space<vmem>>, %arg7: memref<1x128xf32, #tpu.memory_space<vmem>>, %arg8: memref<8x128xf32, #tpu.memory_space<vmem>>) attributes {dimension_semantics = [#tpu.dimension_semantics<parallel>], iteration_bounds = array<i64: 1>, scalar_prefetch = 0 : i64, scratch_operands = 0 : i64, tpu.core_type = #tpu.core_type<tc>, window_params = [{transform_indices = @transform_0, window_bounds = array<i64: 8, 128>}, {pipeline_mode = #tpu.pipeline_mode<synchronous>, transform_indices = @transform_1, window_bounds = array<i64: 128, 512>}, {pipeline_mode = #tpu.pipeline_mode<synchronous>, transform_indices = @transform_2, window_bounds = array<i64: 1, 512>}, {pipeline_mode = #tpu.pipeline_mode<synchronous>, transform_indices = @transform_3, window_bounds = array<i64: 512, 256>}, {pipeline_mode = #tpu.pipeline_mode<synchronous>, transform_indices = @transform_4, window_bounds = array<i64: 1, 256>}, {pipeline_mode = #tpu.pipeline_mode<synchronous>, transform_indices = @transform_5, window_bounds = array<i64: 256, 128>}, {pipeline_mode = #tpu.pipeline_mode<synchronous>, transform_indices = @transform_6, window_bounds = array<i64: 1, 128>}, {transform_indices = @transform_7, window_bounds = array<i64: 8, 128>}]} {
    %c0 = arith.constant 0 : index
    %c0_0 = arith.constant 0 : index
    %0 = vector.load %arg1[%c0, %c0_0] : memref<8x128xbf16, #tpu.memory_space<vmem>>, vector<8x128xbf16>
    %c0_1 = arith.constant 0 : index
    %c0_2 = arith.constant 0 : index
    %1 = vector.load %arg2[%c0_1, %c0_2] : memref<128x512xbf16, #tpu.memory_space<vmem>>, vector<128x512xbf16>
    %cst = arith.constant dense<0.000000e+00> : vector<8x512xf32>
    %2 = tpu.matmul %0, %1, %cst {dimension_numbers = #tpu.dot_dimension_numbers<[1], [0], [0], [1], [0, 0, 1, 1], [], []>} : vector<8x128xbf16>, vector<128x512xbf16>, vector<8x512xf32> -> vector<8x512xf32>
    %c0_3 = arith.constant 0 : index
    %c0_4 = arith.constant 0 : index
    %3 = vector.load %arg3[%c0_3, %c0_4] : memref<1x512xf32, #tpu.memory_space<vmem>>, vector<1x512xf32>
    %4 = vector.broadcast %3 : vector<1x512xf32> to vector<8x512xf32>
    %5 = arith.addf %2, %4 : vector<8x512xf32>
    %cst_5 = arith.constant 0.000000e+00 : f32
    %6 = vector.broadcast %cst_5 : f32 to vector<8x512xf32>
    %7 = arith.maximumf %5, %6 : vector<8x512xf32>
    %8 = arith.truncf %7 : vector<8x512xf32> to vector<8x512xbf16>
    %c0_6 = arith.constant 0 : index
    %c0_7 = arith.constant 0 : index
    %9 = vector.load %arg4[%c0_6, %c0_7] : memref<512x256xbf16, #tpu.memory_space<vmem>>, vector<512x256xbf16>
    %cst_8 = arith.constant dense<0.000000e+00> : vector<8x256xf32>
    %10 = tpu.matmul %8, %9, %cst_8 {dimension_numbers = #tpu.dot_dimension_numbers<[1], [0], [0], [1], [0, 0, 1, 1], [], []>} : vector<8x512xbf16>, vector<512x256xbf16>, vector<8x256xf32> -> vector<8x256xf32>
    %c0_9 = arith.constant 0 : index
    %c0_10 = arith.constant 0 : index
    %11 = vector.load %arg5[%c0_9, %c0_10] : memref<1x256xf32, #tpu.memory_space<vmem>>, vector<1x256xf32>
    %12 = vector.broadcast %11 : vector<1x256xf32> to vector<8x256xf32>
    %13 = arith.addf %10, %12 : vector<8x256xf32>
    %cst_11 = arith.constant 0.000000e+00 : f32
    %14 = vector.broadcast %cst_11 : f32 to vector<8x256xf32>
    %15 = arith.maximumf %13, %14 : vector<8x256xf32>
    %16 = arith.truncf %15 : vector<8x256xf32> to vector<8x256xbf16>
    %c0_12 = arith.constant 0 : index
    %c0_13 = arith.constant 0 : index
    %17 = vector.load %arg6[%c0_12, %c0_13] : memref<256x128xbf16, #tpu.memory_space<vmem>>, vector<256x128xbf16>
    %cst_14 = arith.constant dense<0.000000e+00> : vector<8x128xf32>
    %18 = tpu.matmul %16, %17, %cst_14 {dimension_numbers = #tpu.dot_dimension_numbers<[1], [0], [0], [1], [0, 0, 1, 1], [], []>} : vector<8x256xbf16>, vector<256x128xbf16>, vector<8x128xf32> -> vector<8x128xf32>
    %c0_15 = arith.constant 0 : index
    %c0_16 = arith.constant 0 : index
    %19 = vector.load %arg7[%c0_15, %c0_16] : memref<1x128xf32, #tpu.memory_space<vmem>>, vector<1x128xf32>
    %20 = vector.broadcast %19 : vector<1x128xf32> to vector<8x128xf32>
    %21 = arith.addf %18, %20 : vector<8x128xf32>
    %c0_17 = arith.constant 0 : index
    %c0_18 = arith.constant 0 : index
    %22 = vector.load %arg8[%c0_17, %c0_18] : memref<8x128xf32, #tpu.memory_space<vmem>>, vector<8x128xf32>
    tpu.vector_store %arg8[%c0_17, %c0_18], %21 {strides = array<i32>} : memref<8x128xf32, #tpu.memory_space<vmem>>, vector<8x128xf32>,
    return
  }
  func.func @transform_0(%arg0: i32) -> (i32, i32) {
    %c0_i32 = arith.constant 0 : i32
    %c0_i32_0 = arith.constant 0 : i32
    return %arg0, %c0_i32 : i32, i32
  }
  func.func @transform_1(%arg0: i32) -> (i32, i32) {
    %c0_i32 = arith.constant 0 : i32
    %c0_i32_0 = arith.constant 0 : i32
    %c0_i32_1 = arith.constant 0 : i32
    return %c0_i32, %c0_i32_0 : i32, i32
  }
  func.func @transform_2(%arg0: i32) -> (i32, i32) {
    %c0_i32 = arith.constant 0 : i32
    %c0_i32_0 = arith.constant 0 : i32
    %c0_i32_1 = arith.constant 0 : i32
    return %c0_i32, %c0_i32_0 : i32, i32
  }
  func.func @transform_3(%arg0: i32) -> (i32, i32) {
    %c0_i32 = arith.constant 0 : i32
    %c0_i32_0 = arith.constant 0 : i32
    %c0_i32_1 = arith.constant 0 : i32
    return %c0_i32, %c0_i32_0 : i32, i32
  }
  func.func @transform_4(%arg0: i32) -> (i32, i32) {
    %c0_i32 = arith.constant 0 : i32
    %c0_i32_0 = arith.constant 0 : i32
    %c0_i32_1 = arith.constant 0 : i32
    return %c0_i32, %c0_i32_0 : i32, i32
  }
  func.func @transform_5(%arg0: i32) -> (i32, i32) {
    %c0_i32 = arith.constant 0 : i32
    %c0_i32_0 = arith.constant 0 : i32
    %c0_i32_1 = arith.constant 0 : i32
    return %c0_i32, %c0_i32_0 : i32, i32
  }
  func.func @transform_6(%arg0: i32) -> (i32, i32) {
    %c0_i32 = arith.constant 0 : i32
    %c0_i32_0 = arith.constant 0 : i32
    %c0_i32_1 = arith.constant 0 : i32
    return %c0_i32, %c0_i32_0 : i32, i32
  }
  func.func @transform_7(%arg0: i32) -> (i32, i32) {
    %c0_i32 = arith.constant 0 : i32
    %c0_i32_0 = arith.constant 0 : i32
    return %arg0, %c0_i32 : i32, i32
  }
}

</mosaic_0001>

<bundles_post_ra>
// kernel: tpu_custom_call.1
= control target key start
LH: loop header
LB: loop body
LE: loop exit
PB: predicated region body
PF: predicated region fallthrough
CT: control target
= control target key end

     0   :  { %12 = vsyncpa [#allocation3], 0  ;;  %s1841_s0 = inlined_call_operand.hbm [shape: bf16[8,128], index: 0, kind: input, shape index: {}]   ;;  %s1842_s1 = inlined_call_operand.hbm [shape: bf16[128,512], index: 1, kind: input, shape index: {}]   ;;  %s1843_s2 = inlined_call_operand.hbm [shape: f32[1,512], index: 2, kind: input, shape index: {}]   ;;  %s1844_s3 = inlined_call_operand.hbm [shape: bf16[512,256], index: 3, kind: input, shape index: {}]   ;;  %s1845_s4 = inlined_call_operand.vmem [shape: f32[1,256], index: 4, kind: input, shape index: {}]   ;;  %s1846_s5 = inlined_call_operand.hbm [shape: bf16[256,128], index: 5, kind: input, shape index: {}]   ;;  %s1847_s6 = inlined_call_operand.vmem [shape: f32[1,128], index: 6, kind: input, shape index: {}]   ;;  %s1848_s7 = inlined_call_operand.hbm [shape: f32[8,128], index: 7, kind: output, shape index: {}]  }
   0x1   :  { %13 = vsyncpa [#allocation6], 0 }
   0x2   :  { %14 = vsyncpa [#allocation9], 0  ;;  %s31_s26 = sshll.u32 %s1842_s1, 4  ;;  %s32_s26 = int_to_ptr.hbm [resolvable:$true] %s31_s26 }
   0x3   :  { %15 = vsyncpa [#allocation4], 0  ;;  %s1765_s27 = smov [#allocation5]   ;;  %s55_s8 = sshll.u32 %s1844_s3, 4  ;;  %s56_s8 = int_to_ptr.hbm [resolvable:$true] %s55_s8 }
   0x4   :  { %s33_s28 = sshll.u32 %s1765_s27, 4  ;;  %s1766_s9 = smov 256   ;;  %s34_s28 = int_to_ptr.vmem [resolvable:$true] %s33_s28 }
   0x5   :  { %s1767_s10 = smov 16   ;;  %s1768_s11 = smov [#allocation8]  }
   0x6   :  { %39 = dma.hbm_to_vmem [thread:$0]  %s32_s26, 4096, %s34_s28, [#allocation6], %s1766_s9, %s1766_s9, %s1767_s10  }
   0x7   :  { %s57_s12 = sshll.u32 %s1768_s11, 4  ;;  %s1769_s13 = smov 128   ;;  %s58_s12 = int_to_ptr.vmem [resolvable:$true] %s57_s12 }
   0x8   :  { %s1770_s14 = smov 8   ;;  %s21_s16 = sshll.u32 %s1841_s0, 4  ;;  %s22_s16 = int_to_ptr.hbm [resolvable:$true] %s21_s16 }
   0x9   :  { %63 = dma.hbm_to_vmem [thread:$0]  %s56_s8, 8192, %s58_s12, [#allocation9], %s1769_s13, %s1769_s13, %s1770_s14  }
   0xa   :  { %s1771_s17 = smov [#allocation2]   ;;  %s45_s20 = sshll.u32 %s1843_s2, 4  ;;  %s46_s20 = int_to_ptr.hbm [resolvable:$true] %s45_s20 }
   0xb   :  { %s23_s18 = sshll.u32 %s1771_s17, 4  ;;  %s1772_s21 = smov [#allocation7]   ;;  %s24_s18 = int_to_ptr.vmem [resolvable:$true] %s23_s18 }
   0xc   :  { %26 = dma.hbm_to_vmem [thread:$0]  %s22_s16, 64, %s24_s18, [#allocation3]  }
   0xd   :  { %s47_s22 = sshll.u32 %s1772_s21, 4  ;;  %s70_s25 = sshll.u32 %s1846_s5, 4  ;;  %s48_s22 = int_to_ptr.vmem [resolvable:$true] %s47_s22  ;;  %s71_s25 = int_to_ptr.hbm [resolvable:$true] %s70_s25 }
   0xe   :  { %50 = dma.hbm_to_vmem [thread:$0]  %s46_s20, 64, %s48_s22, [#allocation6]  }
   0xf   :  { %s1773_s0 = smov [#allocation10]   ;;  %s1774_s27 = smov 64  }
  0x10   :  { %s72_s26 = sshll.u32 %s1773_s0, 4  ;;  %s1775_s28 = smov 4   ;;  %s73_s26 = int_to_ptr.vmem [resolvable:$true] %s72_s26 }
  0x11   :  { %78 = dma.hbm_to_vmem [thread:$0]  %s71_s25, 2048, %s73_s26, [#allocation9], %s1774_s27, %s1774_s27, %s1775_s28  }
  0x12   :  { %1757 = dma.done.wait [#allocation3], 64  }
  0x13   :  { %1758 = vsyncadd [#allocation3], 4294967232 }
  0x14   :  { %1759 = dma.done.wait [#allocation6], 4160  }
  0x15   :  { %1760 = vsyncadd [#allocation6], 4294963136 }
  0x16   :  { %1761 = dma.done.wait [#allocation9], 10240  }
  0x17   :  { %1762 = vsyncadd [#allocation9], 4294957056  ;;  %v1154_v0 = vld [vmem:[#allocation5 + $0xe0] sm:$0xf]  ;;  %v1518_v1 = vld [vmem:[#allocation5 + $0xec] sm:$0xf0] }
  0x18   :  { %v1516_v2 = vld [vmem:[#allocation5 + $0xe4] sm:$0xf]  ;;  %v1155_v3 = vor.u32 %v1518_v1, %v1154_v0  ;;  %v1156_v4 = vld [vmem:[#allocation5 + $0xf0] sm:$0xf0]  ;;  %v1162_v5 = vld [vmem:[#allocation5 + $0xe8] sm:$0xf] }
  0x19   :  { %v1519_v6 = vld [vmem:[#allocation5 + $0xf4] sm:$0xf0]  ;;  %v1159_v7 = vor.u32 %v1516_v2, %v1156_v4  ;;  %v1517_v9 = vld [vmem:[#allocation5 + $0xec] sm:$0xf]  ;;  %v1164_v10 = vld [vmem:[#allocation5 + $0xf8] sm:$0xf0] }
  0x1a   :  { %v1163_v8 = vor.u32 %v1519_v6, %v1162_v5  ;;  %v1138_v11 = vld [vmem:[#allocation5 + $0xc0] sm:$0xf]  ;;  %304 = vmatpush.bf16.msra.mxu0 %v1155_v3  ;;  %v1167_v12 = vor.u32 %v1517_v9, %v1164_v10  ;;  %v1514_v13 = vld [vmem:[#allocation5 + $0xcc] sm:$0xf0]  ;;  %v1512_v14 = vld [vmem:[#allocation5 + $0xc4] sm:$0xf] }
  0x1b   :  { %v1140_v15 = vld [vmem:[#allocation5 + $0xd0] sm:$0xf0]  ;;  %317 = vmatpush.bf16.msra.mxu1 %v1159_v7  ;;  %v1139_v16 = vor.u32 %v1514_v13, %v1138_v11  ;;  %v1146_v18 = vld [vmem:[#allocation5 + $0xc8] sm:$0xf]  ;;  %v1515_v19 = vld [vmem:[#allocation5 + $0xd4] sm:$0xf0] }
  0x1c   :  { %330 = vmatpush.bf16.msra.mxu2 %v1163_v8  ;;  %v1143_v17 = vor.u32 %v1512_v14, %v1140_v15  ;;  %v1513_v20 = vld [vmem:[#allocation5 + $0xcc] sm:$0xf]  ;;  %343 = vmatpush.bf16.msra.mxu3 %v1167_v12  ;;  %v1147_v21 = vor.u32 %v1515_v19, %v1146_v18  ;;  %v1148_v22 = vld [vmem:[#allocation5 + $0xd8] sm:$0xf0]  ;;  %v1122_v23 = vld [vmem:[#allocation5 + $0xa0] sm:$0xf] }
  0x1d   :  { %v1510_v24 = vld [vmem:[#allocation5 + $0xac] sm:$0xf0]  ;;  %v1151_v25 = vor.u32 %v1513_v20, %v1148_v22  ;;  %v1508_v26 = vld [vmem:[#allocation5 + $0xa4] sm:$0xf]  ;;  %v1124_v27 = vld [vmem:[#allocation5 + $0xb0] sm:$0xf0] }
  0x1e   :  { %v1130_v28 = vld [vmem:[#allocation5 + $0xa8] sm:$0xf]  ;;  %305 = vmatpush.bf16.msra.mxu0 %v1139_v16  ;;  %v1123_v29 = vor.u32 %v1510_v24, %v1122_v23  ;;  %v1511_v30 = vld [vmem:[#allocation5 + $0xb4] sm:$0xf0]  ;;  %v1509_v31 = vld [vmem:[#allocation5 + $0xac] sm:$0xf]  ;;  %v1127_v33 = vor.u32 %v1508_v26, %v1124_v27 }
  0x1f   :  { %v1132_v32 = vld [vmem:[#allocation5 + $0xb8] sm:$0xf0]  ;;  %318 = vmatpush.bf16.msra.mxu1 %v1143_v17  ;;  %v1131_v34 = vor.u32 %v1511_v30, %v1130_v28  ;;  %v1106_v35 = vld [vmem:[#allocation5 + $0x80] sm:$0xf]  ;;  %v1506_v36 = vld [vmem:[#allocation5 + $0x8c] sm:$0xf0] }
  0x20   :  { %331 = vmatpush.bf16.msra.mxu2 %v1147_v21  ;;  %v1504_v37 = vld [vmem:[#allocation5 + $0x84] sm:$0xf]  ;;  %344 = vmatpush.bf16.msra.mxu3 %v1151_v25  ;;  %v1135_v38 = vor.u32 %v1509_v31, %v1132_v32  ;;  %v1108_v39 = vld [vmem:[#allocation5 + $0x90] sm:$0xf0]  ;;  %v1114_v40 = vld [vmem:[#allocation5 + $0x88] sm:$0xf]  ;;  %v1107_v44 = vor.u32 %v1506_v36, %v1106_v35 }
  0x21   :  { %v1507_v41 = vld [vmem:[#allocation5 + $0x94] sm:$0xf0]  ;;  %v1505_v42 = vld [vmem:[#allocation5 + $0x8c] sm:$0xf]  ;;  %v1116_v43 = vld [vmem:[#allocation5 + $0x98] sm:$0xf0]  ;;  %v1111_v45 = vor.u32 %v1504_v37, %v1108_v39 }
  0x22   :  { %306 = vmatpush.bf16.msra.mxu0 %v1123_v29  ;;  %v1115_v46 = vor.u32 %v1507_v41, %v1114_v40  ;;  %v1090_v47 = vld [vmem:[#allocation5 + $0x60] sm:$0xf]  ;;  %v1502_v48 = vld [vmem:[#allocation5 + $0x6c] sm:$0xf0]  ;;  %v1500_v49 = vld [vmem:[#allocation5 + $0x64] sm:$0xf]  ;;  %v1119_v50 = vor.u32 %v1505_v42, %v1116_v43 }
  0x23   :  { %319 = vmatpush.bf16.msra.mxu1 %v1127_v33  ;;  %v1092_v51 = vld [vmem:[#allocation5 + $0x70] sm:$0xf0]  ;;  %v1098_v52 = vld [vmem:[#allocation5 + $0x68] sm:$0xf]  ;;  %v1503_v53 = vld [vmem:[#allocation5 + $0x74] sm:$0xf0]  ;;  %v1091_v56 = vor.u32 %v1502_v48, %v1090_v47 }
  0x24   :  { %332 = vmatpush.bf16.msra.mxu2 %v1131_v34  ;;  %345 = vmatpush.bf16.msra.mxu3 %v1135_v38  ;;  %v1501_v54 = vld [vmem:[#allocation5 + $0x6c] sm:$0xf]  ;;  %v1100_v55 = vld [vmem:[#allocation5 + $0x78] sm:$0xf0]  ;;  %v1095_v57 = vor.u32 %v1500_v49, %v1092_v51  ;;  %v1099_v58 = vor.u32 %v1503_v53, %v1098_v52  ;;  %v1074_v59 = vld [vmem:[#allocation5 + $0x40] sm:$0xf] }
  0x25   :  { %v1498_v60 = vld [vmem:[#allocation5 + $0x4c] sm:$0xf0]  ;;  %v1496_v61 = vld [vmem:[#allocation5 + $0x44] sm:$0xf]  ;;  %v1103_v62 = vor.u32 %v1501_v54, %v1100_v55  ;;  %v1076_v63 = vld [vmem:[#allocation5 + $0x50] sm:$0xf0] }
  0x26   :  { %307 = vmatpush.bf16.msra.mxu0 %v1107_v44  ;;  %v1082_v0 = vld [vmem:[#allocation5 + $0x48] sm:$0xf]  ;;  %v1499_v1 = vld [vmem:[#allocation5 + $0x54] sm:$0xf0]  ;;  %v1497_v2 = vld [vmem:[#allocation5 + $0x4c] sm:$0xf]  ;;  %v1075_v4 = vor.u32 %v1498_v60, %v1074_v59  ;;  %v1079_v5 = vor.u32 %v1496_v61, %v1076_v63 }
  0x27   :  { %320 = vmatpush.bf16.msra.mxu1 %v1111_v45  ;;  %v1084_v3 = vld [vmem:[#allocation5 + $0x58] sm:$0xf0]  ;;  %v1083_v6 = vor.u32 %v1499_v1, %v1082_v0  ;;  %v1058_v7 = vld [vmem:[#allocation5 + $0x20] sm:$0xf]  ;;  %v1494_v8 = vld [vmem:[#allocation5 + $0x2c] sm:$0xf0] }
  0x28   :  { %333 = vmatpush.bf16.msra.mxu2 %v1115_v46  ;;  %346 = vmatpush.bf16.msra.mxu3 %v1119_v50  ;;  %v1492_v9 = vld [vmem:[#allocation5 + $0x24] sm:$0xf]  ;;  %v1087_v10 = vor.u32 %v1497_v2, %v1084_v3  ;;  %v1060_v11 = vld [vmem:[#allocation5 + $0x30] sm:$0xf0]  ;;  %v1066_v12 = vld [vmem:[#allocation5 + $0x28] sm:$0xf]  ;;  %v1059_v16 = vor.u32 %v1494_v8, %v1058_v7 }
  0x29   :  { %v1495_v13 = vld [vmem:[#allocation5 + $0x34] sm:$0xf0]  ;;  %v1493_v14 = vld [vmem:[#allocation5 + $0x2c] sm:$0xf]  ;;  %v1068_v15 = vld [vmem:[#allocation5 + $0x38] sm:$0xf0]  ;;  %v1063_v18 = vor.u32 %v1492_v9, %v1060_v11 }
  0x2a   :  { %308 = vmatpush.bf16.msra.mxu0 %v1091_v56  ;;  %v1042_v17 = vld [vmem:[#allocation5] sm:$0xf]  ;;  %v1067_v19 = vor.u32 %v1495_v13, %v1066_v12  ;;  %v1490_v20 = vld [vmem:[#allocation5 + $0xc] sm:$0xf0]  ;;  %v1488_v21 = vld [vmem:[#allocation5 + $0x4] sm:$0xf]  ;;  %v1071_v23 = vor.u32 %v1493_v14, %v1068_v15 }
  0x2b   :  { %321 = vmatpush.bf16.msra.mxu1 %v1095_v57  ;;  %v1044_v22 = vld [vmem:[#allocation5 + $0x10] sm:$0xf0]  ;;  %v1050_v24 = vld [vmem:[#allocation5 + $0x8] sm:$0xf]  ;;  %v1491_v25 = vld [vmem:[#allocation5 + $0x14] sm:$0xf0]  ;;  %v1043_v30 = vor.u32 %v1490_v20, %v1042_v17 }
  0x2c   :  { %334 = vmatpush.bf16.msra.mxu2 %v1099_v58  ;;  %347 = vmatpush.bf16.msra.mxu3 %v1103_v62  ;;  %v1489_v26 = vld [vmem:[#allocation5 + $0xc] sm:$0xf]  ;;  %v1052_v27 = vld [vmem:[#allocation5 + $0x18] sm:$0xf0]  ;;  %v1226_v28 = vld [vmem:[#allocation8 + $0x70] sm:$0xf]  ;;  %v1047_v33 = vor.u32 %v1488_v21, %v1044_v22  ;;  %v1051_v34 = vor.u32 %v1491_v25, %v1050_v24 }
  0x2d   :  { %v1535_v29 = vld [vmem:[#allocation8 + $0x74] sm:$0xf0]  ;;  %v1290_v31 = vld [vmem:[#allocation8 + $0xf0] sm:$0xf]  ;;  %v1055_v35 = vor.u32 %v1489_v26, %v1052_v27  ;;  %v1218_v37 = vld [vmem:[#allocation8 + $0x60] sm:$0xf] }
  0x2e   :  { %309 = vmatpush.bf16.msra.mxu0 %v1075_v4  ;;  %v1551_v32 = vld [vmem:[#allocation8 + $0xf4] sm:$0xf0]  ;;  %v1227_v36 = vor.u32 %v1535_v29, %v1226_v28  ;;  %v1354_v38 = vld [vmem:[#allocation8 + $0x170] sm:$0xf]  ;;  %v1533_v41 = vld [vmem:[#allocation8 + $0x64] sm:$0xf0] }
  0x2f   :  { %322 = vmatpush.bf16.msra.mxu1 %v1079_v5  ;;  %v1567_v39 = vld [vmem:[#allocation8 + $0x174] sm:$0xf0]  ;;  %v1291_v40 = vor.u32 %v1551_v32, %v1290_v31  ;;  %v1418_v42 = vld [vmem:[#allocation8 + $0x1f0] sm:$0xf]  ;;  %v1282_v45 = vld [vmem:[#allocation8 + $0xe0] sm:$0xf]  ;;  %v1219_v48 = vor.u32 %v1533_v41, %v1218_v37 }
  0x30   :  { %335 = vmatpush.bf16.msra.mxu2 %v1083_v6  ;;  %348 = vmatpush.bf16.msra.mxu3 %v1087_v10  ;;  %v1583_v43 = vld [vmem:[#allocation8 + $0x1f4] sm:$0xf0]  ;;  %v1549_v46 = vld [vmem:[#allocation8 + $0xe4] sm:$0xf0]  ;;  %v1355_v47 = vor.u32 %v1567_v39, %v1354_v38  ;;  %v1210_v50 = vld [vmem:[#allocation8 + $0x50] sm:$0xf] }
  0x31   :  { %v101_v44 = vld [vmem:[#allocation2] sm:$0xf]  ;;  %v1419_v49 = vor.u32 %v1583_v43, %v1418_v42  ;;  %v1346_v51 = vld [vmem:[#allocation8 + $0x160] sm:$0xf]  ;;  %v1565_v52 = vld [vmem:[#allocation8 + $0x164] sm:$0xf0]  ;;  %v1283_v53 = vor.u32 %v1549_v46, %v1282_v45 }
  0x32   :  { %310 = vmatpush.bf16.msra.mxu0 %v1059_v16  ;;  %v1531_v54 = vld [vmem:[#allocation8 + $0x54] sm:$0xf0]  ;;  %v1410_v55 = vld [vmem:[#allocation8 + $0x1e0] sm:$0xf]  ;;  %v1581_v56 = vld [vmem:[#allocation8 + $0x1e4] sm:$0xf0]  ;;  %v1347_v59 = vor.u32 %v1565_v52, %v1346_v51 }
  0x33   :  { %323 = vmatpush.bf16.msra.mxu1 %v1063_v18  ;;  %v1274_v57 = vld [vmem:[#allocation8 + $0xd0] sm:$0xf]  ;;  %v1547_v58 = vld [vmem:[#allocation8 + $0xd4] sm:$0xf0]  ;;  %v1211_v60 = vor.u32 %v1531_v54, %v1210_v50  ;;  %v1411_v61 = vor.u32 %v1581_v56, %v1410_v55  ;;  %v1202_v62 = vld [vmem:[#allocation8 + $0x40] sm:$0xf] }
  0x34   :  { %336 = vmatpush.bf16.msra.mxu2 %v1067_v19  ;;  %349 = vmatpush.bf16.msra.mxu3 %v1071_v23  ;;  %v1338_v63 = vld [vmem:[#allocation8 + $0x150] sm:$0xf]  ;;  %v1563_v0 = vld [vmem:[#allocation8 + $0x154] sm:$0xf0]  ;;  %v1275_v1 = vor.u32 %v1547_v58, %v1274_v57  ;;  %v1529_v2 = vld [vmem:[#allocation8 + $0x44] sm:$0xf0] }
  0x35   :  { %v1402_v3 = vld [vmem:[#allocation8 + $0x1d0] sm:$0xf]  ;;  %v1579_v4 = vld [vmem:[#allocation8 + $0x1d4] sm:$0xf0]  ;;  %v1266_v5 = vld [vmem:[#allocation8 + $0xc0] sm:$0xf]  ;;  %v1339_v7 = vor.u32 %v1563_v0, %v1338_v63  ;;  %v1203_v8 = vor.u32 %v1529_v2, %v1202_v62 }
  0x36   :  { %311 = vmatpush.bf16.msra.mxu0 %v1043_v30  ;;  %v1545_v6 = vld [vmem:[#allocation8 + $0xc4] sm:$0xf0]  ;;  %v1403_v9 = vor.u32 %v1579_v4, %v1402_v3  ;;  %v1194_v10 = vld [vmem:[#allocation8 + $0x30] sm:$0xf]  ;;  %v1330_v11 = vld [vmem:[#allocation8 + $0x140] sm:$0xf] }
  0x37   :  { %324 = vmatpush.bf16.msra.mxu1 %v1047_v33  ;;  %v1561_v12 = vld [vmem:[#allocation8 + $0x144] sm:$0xf0]  ;;  %v1267_v13 = vor.u32 %v1545_v6, %v1266_v5  ;;  %v1527_v14 = vld [vmem:[#allocation8 + $0x34] sm:$0xf0]  ;;  %v1394_v15 = vld [vmem:[#allocation8 + $0x1c0] sm:$0xf] }
  0x38   :  { %337 = vmatpush.bf16.msra.mxu2 %v1051_v34  ;;  %350 = vmatpush.bf16.msra.mxu3 %v1055_v35  ;;  %v1577_v16 = vld [vmem:[#allocation8 + $0x1c4] sm:$0xf0]  ;;  %v1258_v17 = vld [vmem:[#allocation8 + $0xb0] sm:$0xf]  ;;  %v1543_v18 = vld [vmem:[#allocation8 + $0xb4] sm:$0xf0]  ;;  %v1331_v19 = vor.u32 %v1561_v12, %v1330_v11  ;;  %v1195_v20 = vor.u32 %v1527_v14, %v1194_v10 }
  0x39   :  { %312 = vmatmul.bf16.vlgmr.msra.gmra.mxu0 %v101_v44  ;;  %v1395_v21 = vor.u32 %v1577_v16, %v1394_v15  ;;  %v1186_v22 = vld [vmem:[#allocation8 + $0x20] sm:$0xf]  ;;  %v1322_v23 = vld [vmem:[#allocation8 + $0x130] sm:$0xf]  ;;  %v1559_v24 = vld [vmem:[#allocation8 + $0x134] sm:$0xf0]  ;;  %v1259_v25 = vor.u32 %v1543_v18, %v1258_v17 }
  0x3a   :  { %754 = vmatpush.bf16.msrb.mxu0 %v1227_v36  ;;  %325 = vmatmul.bf16.vlgmr.msra.gmra.mxu1 %v101_v44  ;;  %v1525_v26 = vld [vmem:[#allocation8 + $0x24] sm:$0xf0]  ;;  %v1386_v27 = vld [vmem:[#allocation8 + $0x1b0] sm:$0xf]  ;;  %v1575_v28 = vld [vmem:[#allocation8 + $0x1b4] sm:$0xf0]  ;;  %v1323_v31 = vor.u32 %v1559_v24, %v1322_v23 }
  0x3b   :  { %767 = vmatpush.bf16.msrb.mxu1 %v1291_v40  ;;  %338 = vmatmul.bf16.vlgmr.msra.gmra.mxu2 %v101_v44  ;;  %v1250_v29 = vld [vmem:[#allocation8 + $0xa0] sm:$0xf]  ;;  %v1541_v30 = vld [vmem:[#allocation8 + $0xa4] sm:$0xf0]  ;;  %v1187_v32 = vor.u32 %v1525_v26, %v1186_v22  ;;  %v1387_v33 = vor.u32 %v1575_v28, %v1386_v27  ;;  %v1178_v34 = vld [vmem:[#allocation8 + $0x10] sm:$0xf] }
  0x3c   :  { %351 = vmatmul.bf16.vlgmr.msra.gmra.mxu3 %v101_v44  ;;  %780 = vmatpush.bf16.msrb.mxu2 %v1355_v47  ;;  %v1314_v35 = vld [vmem:[#allocation8 + $0x120] sm:$0xf]  ;;  %v1557_v36 = vld [vmem:[#allocation8 + $0x124] sm:$0xf0]  ;;  %v1251_v37 = vor.u32 %v1541_v30, %v1250_v29  ;;  %v1523_v38 = vld [vmem:[#allocation8 + $0x14] sm:$0xf0] }
  0x3d   :  { %793 = vmatpush.bf16.msrb.mxu3 %v1419_v49  ;;  %v1378_v39 = vld [vmem:[#allocation8 + $0x1a0] sm:$0xf]  ;;  %v1573_v40 = vld [vmem:[#allocation8 + $0x1a4] sm:$0xf0]  ;;  %v1242_v41 = vld [vmem:[#allocation8 + $0x90] sm:$0xf]  ;;  %v1315_v43 = vor.u32 %v1557_v36, %v1314_v35  ;;  %v1179_v45 = vor.u32 %v1523_v38, %v1178_v34 }
  0x3e   :  { %755 = vmatpush.bf16.msrb.mxu0 %v1219_v48  ;;  %v1539_v42 = vld [vmem:[#allocation8 + $0x94] sm:$0xf0]  ;;  %v1170_v44 = vld [vmem:[#allocation8] sm:$0xf]  ;;  %v1379_v46 = vor.u32 %v1573_v40, %v1378_v39  ;;  %v1521_v47 = vld [vmem:[#allocation8 + $0x4] sm:$0xf0] }
  0x3f   :  { %768 = vmatpush.bf16.msrb.mxu1 %v1283_v53  ;;  %v1306_v48 = vld [vmem:[#allocation8 + $0x110] sm:$0xf]  ;;  %v1555_v49 = vld [vmem:[#allocation8 + $0x114] sm:$0xf0]  ;;  %v1243_v50 = vor.u32 %v1539_v42, %v1242_v41  ;;  %v1234_v51 = vld [vmem:[#allocation8 + $0x80] sm:$0xf] }
  0x40   :  { %781 = vmatpush.bf16.msrb.mxu2 %v1347_v59  ;;  %v1370_v52 = vld [vmem:[#allocation8 + $0x190] sm:$0xf]  ;;  %v1571_v53 = vld [vmem:[#allocation8 + $0x194] sm:$0xf0]  ;;  %v1537_v54 = vld [vmem:[#allocation8 + $0x84] sm:$0xf0]  ;;  %v1307_v59 = vor.u32 %v1555_v49, %v1306_v48 }
  0x41   :  { %794 = vmatpush.bf16.msrb.mxu3 %v1411_v61  ;;  %v1534_v55 = vld [vmem:[#allocation8 + $0x74] sm:$0xf]  ;;  %v1228_v56 = vld [vmem:[#allocation8 + $0x78] sm:$0xf0]  ;;  %v1371_v61 = vor.u32 %v1571_v53, %v1370_v52  ;;  %v1532_v62 = vld [vmem:[#allocation8 + $0x64] sm:$0xf]  ;;  %v1235_v2 = vor.u32 %v1537_v54, %v1234_v51 }
  0x42   :  { %756 = vmatpush.bf16.msrb.mxu0 %v1211_v60  ;;  %v1550_v57 = vld [vmem:[#allocation8 + $0xf4] sm:$0xf]  ;;  %v1292_v58 = vld [vmem:[#allocation8 + $0xf8] sm:$0xf0]  ;;  %v1171_v60 = vor.u32 %v1521_v47, %v1170_v44  ;;  %v1298_v63 = vld [vmem:[#allocation8 + $0x100] sm:$0xf]  ;;  %v1231_v3 = vor.u32 %v1534_v55, %v1228_v56 }
  0x43   :  { %769 = vmatpush.bf16.msrb.mxu1 %v1275_v1  ;;  %v1553_v0 = vld [vmem:[#allocation8 + $0x104] sm:$0xf0]  ;;  %v1362_v1 = vld [vmem:[#allocation8 + $0x180] sm:$0xf]  ;;  %v1566_v5 = vld [vmem:[#allocation8 + $0x174] sm:$0xf] }
  0x44   :  { %782 = vmatpush.bf16.msrb.mxu2 %v1339_v7  ;;  %v1569_v4 = vld [vmem:[#allocation8 + $0x184] sm:$0xf0]  ;;  %v1356_v6 = vld [vmem:[#allocation8 + $0x178] sm:$0xf0]  ;;  %v1295_v7 = vor.u32 %v1550_v57, %v1292_v58  ;;  %v1548_v11 = vld [vmem:[#allocation8 + $0xe4] sm:$0xf] }
  0x45   :  { %795 = vmatpush.bf16.msrb.mxu3 %v1403_v9  ;;  %v1582_v9 = vld [vmem:[#allocation8 + $0x1f4] sm:$0xf]  ;;  %v1420_v10 = vld [vmem:[#allocation8 + $0x1f8] sm:$0xf0]  ;;  %v1284_v12 = vld [vmem:[#allocation8 + $0xe8] sm:$0xf0]  ;;  %v1363_v14 = vor.u32 %v1569_v4, %v1362_v1  ;;  %v1359_v15 = vor.u32 %v1566_v5, %v1356_v6 }
  0x46   :  { %757 = vmatpush.bf16.msrb.mxu0 %v1203_v8  ;;  %v1220_v8 = vld [vmem:[#allocation8 + $0x68] sm:$0xf0]  ;;  %v1423_v17 = vor.u32 %v1582_v9, %v1420_v10  ;;  %v1287_v18 = vor.u32 %v1548_v11, %v1284_v12  ;;  %v1276_v23 = vld [vmem:[#allocation8 + $0xd8] sm:$0xf0]  ;;  %v1580_v28 = vld [vmem:[#allocation8 + $0x1e4] sm:$0xf] }
  0x47   :  { %770 = vmatpush.bf16.msrb.mxu1 %v1267_v13  ;;  %v1299_v13 = vor.u32 %v1553_v0, %v1298_v63  ;;  %v1223_v16 = vor.u32 %v1532_v62, %v1220_v8  ;;  %v1348_v26 = vld [vmem:[#allocation8 + $0x168] sm:$0xf0]  ;;  %v1340_v38 = vld [vmem:[#allocation8 + $0x158] sm:$0xf0]  ;;  %v1578_v39 = vld [vmem:[#allocation8 + $0x1d4] sm:$0xf] }
  0x48   :  { %783 = vmatpush.bf16.msrb.mxu2 %v1331_v19  ;;  %v1530_v19 = vld [vmem:[#allocation8 + $0x54] sm:$0xf]  ;;  %v1412_v29 = vld [vmem:[#allocation8 + $0x1e8] sm:$0xf0]  ;;  %v1404_v41 = vld [vmem:[#allocation8 + $0x1d8] sm:$0xf0] }
  0x49   :  { %796 = vmatpush.bf16.msrb.mxu3 %v1395_v21  ;;  %v1546_v21 = vld [vmem:[#allocation8 + $0xd4] sm:$0xf]  ;;  %v1415_v30 = vor.u32 %v1580_v28, %v1412_v29  ;;  %v1268_v35 = vld [vmem:[#allocation8 + $0xc8] sm:$0xf0]  ;;  %v1407_v42 = vor.u32 %v1578_v39, %v1404_v41  ;;  %v1196_v44 = vld [vmem:[#allocation8 + $0x38] sm:$0xf0] }
  0x4a   :  { %758 = vmatpush.bf16.msrb.mxu0 %v1195_v20  ;;  %v1212_v20 = vld [vmem:[#allocation8 + $0x58] sm:$0xf0]  ;;  %v1279_v24 = vor.u32 %v1546_v21, %v1276_v23  ;;  %v1560_v49 = vld [vmem:[#allocation8 + $0x144] sm:$0xf]  ;;  %v1396_v53 = vld [vmem:[#allocation8 + $0x1c8] sm:$0xf0] }
  0x4b   :  { %771 = vmatpush.bf16.msrb.mxu1 %v1259_v25  ;;  %v1215_v22 = vor.u32 %v1530_v19, %v1212_v20  ;;  %v1564_v25 = vld [vmem:[#allocation8 + $0x164] sm:$0xf]  ;;  %v1260_v47 = vld [vmem:[#allocation8 + $0xb8] sm:$0xf0]  ;;  %v1188_v56 = vld [vmem:[#allocation8 + $0x28] sm:$0xf0] }
  0x4c   :  { %784 = vmatpush.bf16.msrb.mxu2 %v1323_v31  ;;  %v1351_v27 = vor.u32 %v1564_v25, %v1348_v26  ;;  %v1528_v31 = vld [vmem:[#allocation8 + $0x44] sm:$0xf]  ;;  %v1324_v62 = vld [vmem:[#allocation8 + $0x138] sm:$0xf0]  ;;  %v1574_v63 = vld [vmem:[#allocation8 + $0x1b4] sm:$0xf] }
  0x4d   :  { %797 = vmatpush.bf16.msrb.mxu3 %v1387_v33  ;;  %v1544_v33 = vld [vmem:[#allocation8 + $0xc4] sm:$0xf]  ;;  %v1388_v1 = vld [vmem:[#allocation8 + $0x1b8] sm:$0xf0]  ;;  %v1538_v5 = vld [vmem:[#allocation8 + $0x94] sm:$0xf] }
  0x4e   :  { %759 = vmatpush.bf16.msrb.mxu0 %v1187_v32  ;;  %v1204_v32 = vld [vmem:[#allocation8 + $0x48] sm:$0xf0]  ;;  %v1271_v36 = vor.u32 %v1544_v33, %v1268_v35  ;;  %v1576_v51 = vld [vmem:[#allocation8 + $0x1c4] sm:$0xf]  ;;  %v1180_v4 = vld [vmem:[#allocation8 + $0x18] sm:$0xf0] }
  0x4f   :  { %772 = vmatpush.bf16.msrb.mxu1 %v1251_v37  ;;  %v1207_v34 = vor.u32 %v1528_v31, %v1204_v32  ;;  %v1562_v37 = vld [vmem:[#allocation8 + $0x154] sm:$0xf]  ;;  %v1399_v54 = vor.u32 %v1576_v51, %v1396_v53  ;;  %v1524_v55 = vld [vmem:[#allocation8 + $0x24] sm:$0xf]  ;;  %v1316_v9 = vld [vmem:[#allocation8 + $0x128] sm:$0xf0] }
  0x50   :  { %785 = vmatpush.bf16.msrb.mxu2 %v1315_v43  ;;  %v1343_v40 = vor.u32 %v1562_v37, %v1340_v38  ;;  %v1526_v43 = vld [vmem:[#allocation8 + $0x34] sm:$0xf]  ;;  %v1540_v57 = vld [vmem:[#allocation8 + $0xa4] sm:$0xf]  ;;  %v1191_v58 = vor.u32 %v1524_v55, %v1188_v56  ;;  %v1372_v25 = vld [vmem:[#allocation8 + $0x198] sm:$0xf0] }
  0x51   :  { %798 = vmatpush.bf16.msrb.mxu3 %v1379_v46  ;;  %v1542_v46 = vld [vmem:[#allocation8 + $0xb4] sm:$0xf]  ;;  %v1556_v8 = vld [vmem:[#allocation8 + $0x124] sm:$0xf]  ;;  %v1300_v28 = vld [vmem:[#allocation8 + $0x108] sm:$0xf0] }
  0x52   :  { %760 = vmatpush.bf16.msrb.mxu0 %v1179_v45  ;;  %v1199_v45 = vor.u32 %v1526_v43, %v1196_v44  ;;  %v1263_v48 = vor.u32 %v1542_v46, %v1260_v47  ;;  %v1319_v11 = vor.u32 %v1556_v8, %v1316_v9  ;;  %v1572_v12 = vld [vmem:[#allocation8 + $0x1a4] sm:$0xf]  ;;  %v1554_v21 = vld [vmem:[#allocation8 + $0x114] sm:$0xf]  ;;  %v1364_v31 = vld [vmem:[#allocation8 + $0x188] sm:$0xf0] }
  0x53   :  { %773 = vmatpush.bf16.msrb.mxu1 %v1243_v50  ;;  %v1332_v50 = vld [vmem:[#allocation8 + $0x148] sm:$0xf0]  ;;  %v1570_v23 = vld [vmem:[#allocation8 + $0x194] sm:$0xf]  ;;  %v1568_v29 = vld [vmem:[#allocation8 + $0x184] sm:$0xf] }
  0x54   :  { %786 = vmatpush.bf16.msrb.mxu2 %v1307_v59  ;;  %v1335_v52 = vor.u32 %v1560_v49, %v1332_v50  ;;  %v1252_v59 = vld [vmem:[#allocation8 + $0xa8] sm:$0xf0]  ;;  %v1375_v26 = vor.u32 %v1570_v23, %v1372_v25  ;;  %v134_v32 = vld [vmem:[#allocation7] sm:$0xf]  ;;  %v1367_v33 = vor.u32 %v1568_v29, %v1364_v31  ;;  %v1590_v51 = vld [vmem:[#allocation10 + $0x30] sm:$0xff]  ;;  %s1776_s30 = smov [#allocation11]  }
  0x55   :  { %799 = vmatpush.bf16.msrb.mxu3 %v1371_v61  ;;  %v1558_v61 = vld [vmem:[#allocation8 + $0x134] sm:$0xf]  ;;  %v137_v35 = vperm.slane %v134_v32, 1  ;;  %v1591_v43 = vld [vmem:[#allocation10 + $0x38] sm:$0xff]  ;;  %v1593_v8 = vld [vmem:[#allocation10 + $0x48] sm:$0xff]  ;;  %s1026_s8 = sshll.u32 %s1776_s30, 4  ;;  %s1027_s8 = int_to_ptr.vmem [resolvable:$true] %s1026_s8 }
  0x56   :  { %761 = vmatpush.bf16.msrb.mxu0 %v1171_v60  ;;  %v1255_v60 = vor.u32 %v1540_v57, %v1252_v59  ;;  %v1327_v0 = vor.u32 %v1558_v61, %v1324_v62  ;;  %v1589_v57 = vld [vmem:[#allocation10 + $0x28] sm:$0xff]  ;;  %v1588_v61 = vld [vmem:[#allocation10 + $0x20] sm:$0xff]  ;;  %v1599_v62 = vld [vmem:[#allocation10 + $0x78] sm:$0xff]  ;;  %s1028_s11 = sshll.u32 %s1848_s7, 4  ;;  %s1029_s11 = int_to_ptr.hbm [resolvable:$true] %s1028_s11 }
  0x57   :  { %774 = vmatpush.bf16.msrb.mxu1 %v1235_v2  ;;  %v1391_v2 = vor.u32 %v1574_v63, %v1388_v1  ;;  %v1587_v63 = vld [vmem:[#allocation10 + $0x18] sm:$0xff]  ;;  %v1598_v1 = vld [vmem:[#allocation10 + $0x70] sm:$0xff] }
  0x58   :  { %787 = vmatpush.bf16.msrb.mxu2 %v1299_v13  ;;  %v1380_v13 = vld [vmem:[#allocation8 + $0x1a8] sm:$0xf0]  ;;  %v428_v9 = vld [vmem:[%s1845_s4] sm:$0x3] }
  0x59   :  { %800 = vmatpush.bf16.msrb.mxu3 %v1363_v14  ;;  %v1520_v14 = vld [vmem:[#allocation8 + $0x4] sm:$0xf] }
  0x5a   :  { %806 = vmatpush.bf16.msra.mxu0 %v1231_v3  ;;  %v1522_v3 = vld [vmem:[#allocation8 + $0x14] sm:$0xf] }
  0x5b   :  { %819 = vmatpush.bf16.msra.mxu1 %v1295_v7  ;;  %v1183_v6 = vor.u32 %v1522_v3, %v1180_v4  ;;  %v1244_v7 = vld [vmem:[#allocation8 + $0x98] sm:$0xf0]  ;;  %v1597_v3 = vld [vmem:[#allocation10 + $0x68] sm:$0xff]  ;;  %v1584_v4 = vld [vmem:[#allocation10] sm:$0xff] }
  0x5c   :  { %832 = vmatpush.bf16.msra.mxu2 %v1359_v15  ;;  %v1247_v10 = vor.u32 %v1538_v5, %v1244_v7  ;;  %v1383_v15 = vor.u32 %v1572_v12, %v1380_v13  ;;  %v1596_v5 = vld [vmem:[#allocation10 + $0x60] sm:$0xff]  ;;  %v1594_v7 = vld [vmem:[#allocation10 + $0x50] sm:$0xff]  ;;  %v430_v12 = vperm.slane %v428_v9, 0 }
  0x5d   :  { %845 = vmatpush.bf16.msra.mxu3 %v1423_v17  ;;  %v1536_v17 = vld [vmem:[#allocation8 + $0x84] sm:$0xf] }
  0x5e   :  { %807 = vmatpush.bf16.msra.mxu0 %v1223_v16  ;;  %v1172_v16 = vld [vmem:[#allocation8 + $0x8] sm:$0xf0]  ;;  %v1592_v13 = vld [vmem:[#allocation10 + $0x40] sm:$0xff] }
  0x5f   :  { %820 = vmatpush.bf16.msra.mxu1 %v1287_v18  ;;  %v1236_v18 = vld [vmem:[#allocation8 + $0x88] sm:$0xf0]  ;;  %v1175_v19 = vor.u32 %v1520_v14, %v1172_v16 }
  0x60   :  { %833 = vmatpush.bf16.msra.mxu2 %v1351_v27  ;;  %v1239_v20 = vor.u32 %v1536_v17, %v1236_v18  ;;  %v1552_v27 = vld [vmem:[#allocation8 + $0x104] sm:$0xf] }
  0x61   :  { %846 = vmatpush.bf16.msra.mxu3 %v1415_v30  ;;  %v1303_v30 = vor.u32 %v1552_v27, %v1300_v28 }
  0x62   :  { %808 = vmatpush.bf16.msra.mxu0 %v1215_v22  ;;  %v1308_v22 = vld [vmem:[#allocation8 + $0x118] sm:$0xf0] }
  0x63   :  { %821 = vmatpush.bf16.msra.mxu1 %v1279_v24  ;;  %v1311_v24 = vor.u32 %v1554_v21, %v1308_v22 }
  0x64   :  { %834 = vmatpush.bf16.msra.mxu2 %v1343_v40 }
  0x65   :  { %847 = vmatpush.bf16.msra.mxu3 %v1407_v42  ;;  %v138_v42 = vperm.slane %v134_v32, 2 }
  0x66   :  { %809 = vmatpush.bf16.msra.mxu0 %v1207_v34  ;;  %v136_v34 = vperm.slane %v134_v32, 0 }
  0x67   :  { %822 = vmatpush.bf16.msra.mxu1 %v1271_v36 }
  0x68   :  { %835 = vmatpush.bf16.msra.mxu2 %v1335_v52 }
  0x69   :  { %848 = vmatpush.bf16.msra.mxu3 %v1399_v54 }
  0x6a   :  { %810 = vmatpush.bf16.msra.mxu0 %v1199_v45  ;;  %v139_v45 = vperm.slane %v134_v32, 3 }
  0x6b   :  { %823 = vmatpush.bf16.msra.mxu1 %v1263_v48 }
  0x6c   :  { %836 = vmatpush.bf16.msra.mxu2 %v1327_v0  ;;  %v1586_v0 = vld [vmem:[#allocation10 + $0x10] sm:$0xff] }
  0x6d   :  { %849 = vmatpush.bf16.msra.mxu3 %v1391_v2  ;;  %v1585_v2 = vld [vmem:[#allocation10 + $0x8] sm:$0xff] }
  0x6e   :  { %811 = vmatpush.bf16.msra.mxu0 %v1191_v58 }
  0x6f   :  { %824 = vmatpush.bf16.msra.mxu1 %v1255_v60 }
  0x70   :  { %837 = vmatpush.bf16.msra.mxu2 %v1319_v11 }
  0x71   :  { %850 = vmatpush.bf16.msra.mxu3 %v1383_v15 }
  0x72   :  { %812 = vmatpush.bf16.msra.mxu0 %v1183_v6  ;;  %v1595_v6 = vld [vmem:[#allocation10 + $0x58] sm:$0xff] }
  0x73   :  { %825 = vmatpush.bf16.msra.mxu1 %v1247_v10 }
  0x74   :  { %838 = vmatpush.bf16.msra.mxu2 %v1311_v24 }
  0x75   :  { %851 = vmatpush.bf16.msra.mxu3 %v1375_v26  ;;  %v431_v26 = vperm.slane %v428_v9, 1 }
  0x76   :  { %813 = vmatpush.bf16.msra.mxu0 %v1175_v19 }
  0x77   :  { %826 = vmatpush.bf16.msra.mxu1 %v1239_v20 }
  0x78   :  { %839 = vmatpush.bf16.msra.mxu2 %v1303_v30 }
  0x79   :  { %852 = vmatpush.bf16.msra.mxu3 %v1367_v33 }
  0xb6   :  { %v313_v36 = vpop.f32.mrf.mxu0 }
  0xb7   :  { %v314_v37 = vadd.f32 %v313_v36, %v136_v34  ;;  %v326_v38 = vpop.f32.mrf.mxu1 }
  0xb8   :  { %v327_v39 = vadd.f32 %v326_v38, %v137_v35 }
  0xb9   :  { %v356_v40 = vmax.f32 %v314_v37, 0.0 }
  0xba   :  { %v357_v41 = vmax.f32 %v327_v39, 0.0 }
  0xbb   :  { %v360_v44 = vpack.c.bf16 %v356_v40, %v356_v40 }
  0xbc   :  { %v361_v46 = vpack.c.bf16 %v357_v41, %v357_v41 }
  0xbd   :  { %762 = vmatmul.bf16.vlgmr.msrb.gmra.mxu0 %v360_v44 }
  0xbe   :  { %v339_v47 = vpop.f32.mrf.mxu2  ;;  %775 = vmatmul.bf16.vlgmr.msrb.gmra.mxu1 %v361_v46  ;;  %v315_v50 = vpop.f32.mrf.mxu0  ;;  %994 = vmatpush.bf16.msrb.mxu0 %v1591_v43  ;;  %v1612_v43 = vld [vmem:[%s1847_s6] ss:$0 sm:$0xff] }
  0xbf   :  { %v340_v48 = vadd.f32 %v339_v47, %v138_v42  ;;  %v352_v49 = vpop.f32.mrf.mxu3  ;;  %v328_v53 = vpop.f32.mrf.mxu1  ;;  %1007 = vmatpush.bf16.msrb.mxu1 %v1599_v62 }
  0xc0   :  { %v353_v52 = vadd.f32 %v352_v49, %v139_v45 }
  0xc1   :  { %v358_v54 = vmax.f32 %v340_v48, 0.0 }
  0xc2   :  { %v359_v55 = vmax.f32 %v353_v52, 0.0  ;;  %995 = vmatpush.bf16.msrb.mxu0 %v1590_v51 }
  0xc3   :  { %v362_v56 = vpack.c.bf16 %v358_v54, %v358_v54  ;;  %1008 = vmatpush.bf16.msrb.mxu1 %v1598_v1 }
  0xc4   :  { %v363_v58 = vpack.c.bf16 %v359_v55, %v359_v55 }
  0xc5   :  { %788 = vmatmul.bf16.vlgmr.msrb.gmra.mxu2 %v362_v56 }
  0xc6   :  { %801 = vmatmul.bf16.vlgmr.msrb.gmra.mxu3 %v363_v58  ;;  %v341_v59 = vpop.f32.mrf.mxu2  ;;  %996 = vmatpush.bf16.msrb.mxu0 %v1589_v57 }
  0xc7   :  { %v354_v60 = vpop.f32.mrf.mxu3  ;;  %1009 = vmatpush.bf16.msrb.mxu1 %v1597_v3 }
  0xca   :  { %997 = vmatpush.bf16.msrb.mxu0 %v1588_v61 }
  0xcb   :  { %1010 = vmatpush.bf16.msrb.mxu1 %v1596_v5 }
  0xcd   :  { %814 = vmatmul.bf16.vlgmr.msra.gmra.mxu0 %v360_v44 }
  0xce   :  { %827 = vmatmul.bf16.vlgmr.msra.gmra.mxu1 %v361_v46  ;;  %998 = vmatpush.bf16.msrb.mxu0 %v1587_v63 }
  0xcf   :  { %1011 = vmatpush.bf16.msrb.mxu1 %v1595_v6 }
  0xd2   :  { %999 = vmatpush.bf16.msrb.mxu0 %v1586_v0 }
  0xd3   :  { %1012 = vmatpush.bf16.msrb.mxu1 %v1594_v7 }
  0xd5   :  { %840 = vmatmul.bf16.vlgmr.msra.gmra.mxu2 %v362_v56 }
  0xd6   :  { %853 = vmatmul.bf16.vlgmr.msra.gmra.mxu3 %v363_v58  ;;  %1000 = vmatpush.bf16.msrb.mxu0 %v1585_v2 }
  0xd7   :  { %1013 = vmatpush.bf16.msrb.mxu1 %v1593_v8 }
  0xda   :  { %1001 = vmatpush.bf16.msrb.mxu0 %v1584_v4 }
  0xdb   :  { %1014 = vmatpush.bf16.msrb.mxu1 %v1592_v13 }
 0x13a   :  { %v763_v10 = vpop.f32.mrf.mxu0 }
 0x13b   :  { %v776_v11 = vpop.f32.mrf.mxu1  ;;  %v764_v14 = vadd.f32 %v763_v10, %v430_v12 }
 0x13d   :  { %v777_v17 = vadd.f32 %v776_v11, %v764_v14 }
 0x142   :  { %v765_v15 = vpop.f32.mrf.mxu0 }
 0x143   :  { %v778_v16 = vpop.f32.mrf.mxu1 }
 0x148   :  { %v789_v18 = vpop.f32.mrf.mxu2 }
 0x149   :  { %v790_v19 = vadd.f32 %v789_v18, %v777_v17  ;;  %v802_v20 = vpop.f32.mrf.mxu3 }
 0x14a   :  { %v815_v22 = vpop.f32.mrf.mxu0 }
 0x14b   :  { %v803_v21 = vadd.f32 %v802_v20, %v790_v19  ;;  %v828_v23 = vpop.f32.mrf.mxu1  ;;  %v816_v29 = vadd.f32 %v815_v22, %v431_v26 }
 0x14d   :  { %v858_v24 = vmax.f32 %v803_v21, 0.0  ;;  %v829_v32 = vadd.f32 %v828_v23, %v816_v29 }
 0x14f   :  { %v860_v25 = vpack.c.bf16 %v858_v24, %v858_v24 }
 0x150   :  { %v791_v27 = vpop.f32.mrf.mxu2 }
 0x151   :  { %v804_v28 = vpop.f32.mrf.mxu3  ;;  %1002 = vmatmul.bf16.vlgmr.msrb.gmra.mxu0 %v860_v25 }
 0x152   :  { %v817_v30 = vpop.f32.mrf.mxu0 }
 0x153   :  { %v830_v31 = vpop.f32.mrf.mxu1 }
 0x158   :  { %v841_v33 = vpop.f32.mrf.mxu2 }
 0x159   :  { %v842_v34 = vadd.f32 %v841_v33, %v829_v32  ;;  %v854_v35 = vpop.f32.mrf.mxu3 }
 0x15b   :  { %v855_v36 = vadd.f32 %v854_v35, %v842_v34 }
 0x15d   :  { %v859_v37 = vmax.f32 %v855_v36, 0.0 }
 0x15f   :  { %v861_v38 = vpack.c.bf16 %v859_v37, %v859_v37 }
 0x160   :  { %v843_v39 = vpop.f32.mrf.mxu2 }
 0x161   :  { %v856_v40 = vpop.f32.mrf.mxu3  ;;  %1015 = vmatmul.bf16.vlgmr.msrb.gmra.mxu1 %v861_v38 }
 0x1ce   :  { %v1003_v41 = vpop.f32.mrf.mxu0 }
 0x1cf   :  { %v1004_v44 = vadd.f32 %v1612_v43, %v1003_v41 }
 0x1d6   :  { %v1005_v42 = vpop.f32.mrf.mxu0 }
 0x1de   :  { %v1016_v45 = vpop.f32.mrf.mxu1 }
 0x1df   :  { %v1017_v46 = vadd.f32 %v1016_v45, %v1004_v44 }
 0x1e1   :  { %1020 = vst [vmem:[#allocation11] sm:$0xff] %v1017_v46 }
 0x1e2   :  { %1031 = dma.vmem_to_hbm [thread:$0]  %s1027_s8, 128, %s1029_s11, [#allocation4]  }
 0x1e6   :  { %v1018_v47 = vpop.f32.mrf.mxu1 }
 0x1e7   :  { %1763 = dma.done.wait [#allocation4], 128  }
 0x1e8   :  { %1764 = vsyncadd [#allocation4], 4294967168 }
 0x1e9   :  { %1036 = vsyncpa [#allocation3], 1 }
 0x1ea   :  { %1037 = vsyncpa [#allocation6], 1 }
 0x1eb   :  { %1038 = vsyncpa [#allocation9], 1 }
 0x1ec   :  { %1039 = vsyncpa [#allocation4], 1 }

</bundles_post_ra>
